<compile_context>
chip_gen: v7x
topology: tpu7x:2x2x1
jax: 0.10.0
libtpu: 0.0.40
codegen_flags: <defaults>
</compile_context>

<pallas_src>
import functools

import jax
import jax.numpy as jnp
from jax.experimental import pallas as pl
from jax.experimental.pallas import tpu as pltpu


def _shift_cols(a, s):
    """Zero-filled shift along the last axis: out[:, p] = a[:, p + s]."""
    if s == 0:
        return a
    r, _ = a.shape
    z = jnp.zeros((r, abs(s)), a.dtype)
    if s > 0:
        return jnp.concatenate([a[:, s:], z], axis=1)
    return jnp.concatenate([z, a[:, :s]], axis=1)


def ema_kernel(x_ref, pool_ref, evt_ref, w1_ref, b1_ref, w3_ref, b3_ref,
               ob_ref, gnw_ref, gnb_ref, o_ref, *, H, W):
    # x_ref : (R, HW)       pool_ref: (HW, H+W)     evt_ref: (H+W, 2*HW)
    # w1_ref: (R, R)        b1_ref  : (R, 1)        w3_ref : (R, 9*R)
    # b3_ref: (R, 1)        ob_ref  : (R, R)        gnw/gnb: (R, 1)
    f32 = jnp.float32
    R, HW = x_ref.shape
    inv_hw = 1.0 / (H * W)

    gx = x_ref[...].astype(f32)                      # (R, HW)
    pool = pool_ref[...]
    evt = evt_ref[...]
    w1 = w1_ref[...]
    w3 = w3_ref[...]
    ob = ob_ref[...]
    b1 = b1_ref[...]
    b3 = b3_ref[...]
    gnw = gnw_ref[...]
    gnb = gnb_ref[...]

    # ---- directional avg pools + 1x1 conv (block-diag channel mix) ----
    cat = jnp.dot(gx, pool, preferred_element_type=f32)        # (R, H+W)
    vt = jnp.dot(w1, cat, preferred_element_type=f32) + b1     # (R, H+W)
    sg = jax.nn.sigmoid(vt)

    # Expand per-row / per-column gates back onto the flat H*W axis: one
    # matmul producing [gate_rows | gate_cols] side by side on the lane axis.
    gate2 = jnp.dot(sg, evt, preferred_element_type=f32)       # (R, 2*HW)
    att = gx * gate2[:, :HW] * gate2[:, HW:]                   # (R, HW)

    # ---- GroupNorm (num_groups == channels -> per-row over H*W) ----
    mean = jnp.sum(att, axis=1, keepdims=True) * inv_hw
    cen = att - mean
    var = jnp.sum(cen * cen, axis=1, keepdims=True) * inv_hw
    x1 = cen * (gnw * jax.lax.rsqrt(var + 1e-5)) + gnb          # (R, HW)

    # ---- 3x3 conv (padding=1): 9 shifted + column-masked taps, one matmul ----
    col = jax.lax.broadcasted_iota(jnp.int32, (1, HW), 1) % W
    left_ok = (col >= 1).astype(f32)                            # valid for dx=-1
    right_ok = (col <= W - 2).astype(f32)                       # valid for dx=+1
    taps = []
    for k in range(9):
        dy, dx = k // 3 - 1, k % 3 - 1
        t = _shift_cols(gx, dy * W + dx)
        if dx == -1:
            t = t * left_ok
        elif dx == 1:
            t = t * right_ok
        taps.append(t)
    taps = jnp.concatenate(taps, axis=0)                        # (9R, HW)
    x2 = jnp.dot(w3, taps, preferred_element_type=f32) + b3     # (R, HW)

    # ---- global avg pools + per-group channel softmax ----
    s1 = jnp.sum(x1, axis=1, keepdims=True) * inv_hw            # (R, 1)
    s2 = jnp.sum(x2, axis=1, keepdims=True) * inv_hw
    e1 = jnp.exp(s1 - jnp.max(s1))   # any within-group constant shift is exact
    e2 = jnp.exp(s2 - jnp.max(s2))
    d = jnp.dot(ob, jnp.concatenate([e1, e2], axis=1),
                preferred_element_type=f32)                     # per-group sums
    x11 = e1 / d[:, 0:1]                                        # (R, 1)
    x21 = e2 / d[:, 1:2]

    # ---- cross attention map: group-wise channel reduction + broadcast ----
    wmap = jnp.dot(ob, x11 * x2 + x21 * x1,
                   preferred_element_type=f32)                  # (R, HW)
    o_ref[...] = (gx * jax.nn.sigmoid(wmap)).astype(o_ref.dtype)


def _pick_tb(bg, cg, target):
    # Prefer a block whose row count (tb*cg) is sublane-aligned (multiple of 8).
    for t in range(min(target, bg), 0, -1):
        if bg % t == 0 and (t * cg) % 8 == 0:
            return t
    return bg   # single block spanning all rows (exempt from the /8 rule)


def ema_forward(x, params, groups, tb_target=4):
    b, c, h, w = x.shape
    assert c % groups == 0
    cg = c // groups
    bg = b * groups
    hw = h * w
    gx = x.reshape(bg * cg, hw)                     # lane-dense: H*W on lanes

    tb = _pick_tb(bg, cg, tb_target)
    rows = tb * cg                                  # rows per grid step

    f32 = jnp.float32
    eye_tb = jnp.eye(tb, dtype=f32)

    w1 = params["w1"].reshape(cg, cg).astype(f32)
    w1big = jnp.kron(eye_tb, w1)                                        # (R, R)
    b1r = jnp.tile(params["b1"].astype(f32).reshape(-1), tb).reshape(rows, 1)

    w3 = params["w3"].astype(f32)                                        # (cg, cg, 3, 3)
    w3big = jnp.concatenate(
        [jnp.kron(eye_tb, w3[:, :, kh, kw]) for kh in range(3) for kw in range(3)],
        axis=1)                                                          # (R, 9R)
    b3r = jnp.tile(params["b3"].astype(f32).reshape(-1), tb).reshape(rows, 1)

    gnwr = jnp.tile(params["gn_w"].astype(f32).reshape(-1), tb).reshape(rows, 1)
    gnbr = jnp.tile(params["gn_b"].astype(f32).reshape(-1), tb).reshape(rows, 1)

    ob = jnp.kron(eye_tb, jnp.ones((cg, cg), f32))                       # (R, R)

    # Pooling / expansion matrices for the flattened spatial axis.
    r_idx = jnp.arange(hw, dtype=jnp.int32) // w
    c_idx = jnp.arange(hw, dtype=jnp.int32) % w
    pv = (r_idx[:, None] == jnp.arange(h)[None, :]).astype(f32) / w      # (hw, h)
    pt = (c_idx[:, None] == jnp.arange(w)[None, :]).astype(f32) / h      # (hw, w)
    pool = jnp.concatenate([pv, pt], axis=1)                             # (hw, h+w)
    ev = jnp.concatenate([(pv * w).T, jnp.zeros((w, hw), f32)], axis=0)  # (h+w, hw)
    et = jnp.concatenate([jnp.zeros((h, hw), f32), (pt * h).T], axis=0)  # (h+w, hw)
    evt = jnp.concatenate([ev, et], axis=1)                              # (h+w, 2*hw)

    kernel = functools.partial(ema_kernel, H=h, W=w)

    out = pl.pallas_call(
        kernel,
        out_shape=jax.ShapeDtypeStruct((bg * cg, hw), x.dtype),
        grid_spec=pltpu.PrefetchScalarGridSpec(
            num_scalar_prefetch=0,
            grid=(bg // tb,),
            in_specs=[
                pl.BlockSpec((rows, hw), lambda n: (n, 0)),
                pl.BlockSpec((hw, h + w), lambda n: (0, 0)),
                pl.BlockSpec((h + w, 2 * hw), lambda n: (0, 0)),
                pl.BlockSpec((rows, rows), lambda n: (0, 0)),
                pl.BlockSpec((rows, 1), lambda n: (0, 0)),
                pl.BlockSpec((rows, 9 * rows), lambda n: (0, 0)),
                pl.BlockSpec((rows, 1), lambda n: (0, 0)),
                pl.BlockSpec((rows, rows), lambda n: (0, 0)),
                pl.BlockSpec((rows, 1), lambda n: (0, 0)),
                pl.BlockSpec((rows, 1), lambda n: (0, 0)),
            ],
            out_specs=pl.BlockSpec((rows, hw), lambda n: (n, 0)),
        ),
        compiler_params=pltpu.CompilerParams(dimension_semantics=("parallel",)),
    )(gx, pool, evt, w1big, b1r, w3big, b3r, ob, gnwr, gnbr)
    return out.reshape(b, c, h, w)


def ema_reference(x, params, groups):
    """Pure-JAX reference mirroring the PyTorch forward exactly."""
    b, c, h, w = x.shape
    cg = c // groups
    gx = x.reshape(b * groups, cg, h, w)
    x_v = jnp.mean(gx, axis=3, keepdims=True)                                # (bg,cg,h,1)
    x_t = jnp.transpose(jnp.mean(gx, axis=2, keepdims=True), (0, 1, 3, 2))   # (bg,cg,w,1)
    cat = jnp.concatenate([x_v, x_t], axis=2)                                # (bg,cg,h+w,1)
    w1 = params["w1"].reshape(cg, cg)
    vt = jnp.einsum("oc,bcsl->bosl", w1, cat) + params["b1"][None, :, None, None]
    xv2, xt2 = vt[:, :, :h, :], vt[:, :, h:, :]
    att = gx * jax.nn.sigmoid(xv2) * jax.nn.sigmoid(jnp.transpose(xt2, (0, 1, 3, 2)))
    mean = jnp.mean(att, axis=(2, 3), keepdims=True)
    var = jnp.mean((att - mean) ** 2, axis=(2, 3), keepdims=True)
    x1 = ((att - mean) / jnp.sqrt(var + 1e-5)
          * params["gn_w"][None, :, None, None] + params["gn_b"][None, :, None, None])
    x2 = jax.lax.conv_general_dilated(
        gx, params["w3"], (1, 1), ((1, 1), (1, 1)),
        dimension_numbers=("NCHW", "OIHW", "NCHW")) + params["b3"][None, :, None, None]
    s1 = jnp.mean(x1, axis=(2, 3))
    s2 = jnp.mean(x2, axis=(2, 3))
    x11 = jax.nn.softmax(s1, axis=-1)[:, None, :]
    x21 = jax.nn.softmax(s2, axis=-1)[:, None, :]
    x12 = x2.reshape(b * groups, cg, h * w)
    x22 = x1.reshape(b * groups, cg, h * w)
    weights = (jnp.matmul(x11, x12) + jnp.matmul(x21, x22)).reshape(b * groups, 1, h, w)
    return (gx * jax.nn.sigmoid(weights)).reshape(b, c, h, w)


if __name__ == "__main__":
    key = jax.random.PRNGKey(0)
    b, c, h, w = 2, 16, 16, 16
    groups = 4                      # factor; channels // groups = 4 > 0
    cg = c // groups
    ks = jax.random.split(key, 6)

    x = jax.random.normal(ks[0], (b, c, h, w), jnp.float32)
    params = {
        "w1": 0.2 * jax.random.normal(ks[1], (cg, cg, 1, 1), jnp.float32),
        "b1": 0.1 * jax.random.normal(ks[2], (cg,), jnp.float32),
        "w3": 0.1 * jax.random.normal(ks[3], (cg, cg, 3, 3), jnp.float32),
        "b3": 0.1 * jax.random.normal(ks[4], (cg,), jnp.float32),
        "gn_w": jnp.ones((cg,), jnp.float32) + 0.1 * jax.random.normal(ks[5], (cg,), jnp.float32),
        "gn_b": jnp.zeros((cg,), jnp.float32),
    }

    out = ema_forward(x, params, groups)
    jax.block_until_ready(out)

    ref = ema_reference(x, params, groups)
    assert out.shape == (b, c, h, w)
    max_err = float(jnp.max(jnp.abs(out - ref)))
    if not bool(jnp.allclose(out, ref, atol=1e-4, rtol=1e-4)):
        raise AssertionError(f"Pallas/reference mismatch, max abs err = {max_err}")
    print("KERNEL_OK")
</pallas_src>

<mosaic_0001>
module attributes {stable_mosaic.version = 11 : i64} {
  func.func @ema_kernel(%arg0: i32, %arg1: memref<16x256xf32, #tpu.memory_space<vmem>>, %arg2: memref<256x32xf32, #tpu.memory_space<vmem>>, %arg3: memref<32x512xf32, #tpu.memory_space<vmem>>, %arg4: memref<16x16xf32, #tpu.memory_space<vmem>>, %arg5: memref<16x1xf32, #tpu.memory_space<vmem>>, %arg6: memref<16x144xf32, #tpu.memory_space<vmem>>, %arg7: memref<16x1xf32, #tpu.memory_space<vmem>>, %arg8: memref<16x16xf32, #tpu.memory_space<vmem>>, %arg9: memref<16x1xf32, #tpu.memory_space<vmem>>, %arg10: memref<16x1xf32, #tpu.memory_space<vmem>>, %arg11: memref<16x256xf32, #tpu.memory_space<vmem>>) attributes {dimension_semantics = [#tpu.dimension_semantics<parallel>], iteration_bounds = array<i64: 2>, scalar_prefetch = 0 : i64, scratch_operands = 0 : i64, tpu.core_type = #tpu.core_type<tc>, window_params = [{transform_indices = @transform_0, window_bounds = array<i64: 16, 256>}, {pipeline_mode = #tpu.pipeline_mode<synchronous>, transform_indices = @transform_1, window_bounds = array<i64: 256, 32>}, {pipeline_mode = #tpu.pipeline_mode<synchronous>, transform_indices = @transform_2, window_bounds = array<i64: 32, 512>}, {pipeline_mode = #tpu.pipeline_mode<synchronous>, transform_indices = @transform_3, window_bounds = array<i64: 16, 16>}, {pipeline_mode = #tpu.pipeline_mode<synchronous>, transform_indices = @transform_4, window_bounds = array<i64: 16, 1>}, {pipeline_mode = #tpu.pipeline_mode<synchronous>, transform_indices = @transform_5, window_bounds = array<i64: 16, 144>}, {pipeline_mode = #tpu.pipeline_mode<synchronous>, transform_indices = @transform_6, window_bounds = array<i64: 16, 1>}, {pipeline_mode = #tpu.pipeline_mode<synchronous>, transform_indices = @transform_7, window_bounds = array<i64: 16, 16>}, {pipeline_mode = #tpu.pipeline_mode<synchronous>, transform_indices = @transform_8, window_bounds = array<i64: 16, 1>}, {pipeline_mode = #tpu.pipeline_mode<synchronous>, transform_indices = @transform_9, window_bounds = array<i64: 16, 1>}, {transform_indices = @transform_10, window_bounds = array<i64: 16, 256>}]} {
    %c0 = arith.constant 0 : index
    %c0_0 = arith.constant 0 : index
    %0 = vector.load %arg1[%c0, %c0_0] : memref<16x256xf32, #tpu.memory_space<vmem>>, vector<16x256xf32>
    %c0_1 = arith.constant 0 : index
    %c0_2 = arith.constant 0 : index
    %1 = vector.load %arg2[%c0_1, %c0_2] : memref<256x32xf32, #tpu.memory_space<vmem>>, vector<256x32xf32>
    %c0_3 = arith.constant 0 : index
    %c0_4 = arith.constant 0 : index
    %2 = vector.load %arg3[%c0_3, %c0_4] : memref<32x512xf32, #tpu.memory_space<vmem>>, vector<32x512xf32>
    %c0_5 = arith.constant 0 : index
    %c0_6 = arith.constant 0 : index
    %3 = vector.load %arg4[%c0_5, %c0_6] : memref<16x16xf32, #tpu.memory_space<vmem>>, vector<16x16xf32>
    %c0_7 = arith.constant 0 : index
    %c0_8 = arith.constant 0 : index
    %4 = vector.load %arg6[%c0_7, %c0_8] : memref<16x144xf32, #tpu.memory_space<vmem>>, vector<16x144xf32>
    %c0_9 = arith.constant 0 : index
    %c0_10 = arith.constant 0 : index
    %5 = vector.load %arg8[%c0_9, %c0_10] : memref<16x16xf32, #tpu.memory_space<vmem>>, vector<16x16xf32>
    %c0_11 = arith.constant 0 : index
    %c0_12 = arith.constant 0 : index
    %6 = vector.load %arg5[%c0_11, %c0_12] : memref<16x1xf32, #tpu.memory_space<vmem>>, vector<16x1xf32>
    %c0_13 = arith.constant 0 : index
    %c0_14 = arith.constant 0 : index
    %7 = vector.load %arg7[%c0_13, %c0_14] : memref<16x1xf32, #tpu.memory_space<vmem>>, vector<16x1xf32>
    %c0_15 = arith.constant 0 : index
    %c0_16 = arith.constant 0 : index
    %8 = vector.load %arg9[%c0_15, %c0_16] : memref<16x1xf32, #tpu.memory_space<vmem>>, vector<16x1xf32>
    %c0_17 = arith.constant 0 : index
    %c0_18 = arith.constant 0 : index
    %9 = vector.load %arg10[%c0_17, %c0_18] : memref<16x1xf32, #tpu.memory_space<vmem>>, vector<16x1xf32>
    %cst = arith.constant dense<0.000000e+00> : vector<16x32xf32>
    %10 = tpu.matmul %0, %1, %cst {dimension_numbers = #tpu.dot_dimension_numbers<[1], [0], [0], [1], [0, 0, 1, 1], [], []>} : vector<16x256xf32>, vector<256x32xf32>, vector<16x32xf32> -> vector<16x32xf32>
    %cst_19 = arith.constant dense<0.000000e+00> : vector<16x32xf32>
    %11 = tpu.matmul %3, %10, %cst_19 {dimension_numbers = #tpu.dot_dimension_numbers<[1], [0], [0], [1], [0, 0, 1, 1], [], []>} : vector<16x16xf32>, vector<16x32xf32>, vector<16x32xf32> -> vector<16x32xf32>
    %12 = vector.broadcast %6 : vector<16x1xf32> to vector<16x32xf32>
    %13 = arith.addf %11, %12 : vector<16x32xf32>
    %14 = arith.negf %13 : vector<16x32xf32>
    %15 = math.exp %14 : vector<16x32xf32>
    %cst_20 = arith.constant 1.000000e+00 : f32
    %16 = vector.broadcast %cst_20 : f32 to vector<16x32xf32>
    %17 = arith.addf %16, %15 : vector<16x32xf32>
    %18 = arith.divf %16, %17 : vector<16x32xf32>
    %cst_21 = arith.constant dense<0.000000e+00> : vector<16x512xf32>
    %19 = tpu.matmul %18, %2, %cst_21 {dimension_numbers = #tpu.dot_dimension_numbers<[1], [0], [0], [1], [0, 0, 1, 1], [], []>} : vector<16x32xf32>, vector<32x512xf32>, vector<16x512xf32> -> vector<16x512xf32>
    %20 = vector.extract_strided_slice %19 {offsets = [0, 0], sizes = [16, 256], strides = [1, 1]} : vector<16x512xf32> to vector<16x256xf32>
    %21 = arith.mulf %0, %20 : vector<16x256xf32>
    %22 = vector.extract_strided_slice %19 {offsets = [0, 256], sizes = [16, 256], strides = [1, 1]} : vector<16x512xf32> to vector<16x256xf32>
    %23 = arith.mulf %21, %22 : vector<16x256xf32>
    %cst_22 = arith.constant dense<0.000000e+00> : vector<16xf32>
    %24 = vector.multi_reduction <add>, %23, %cst_22 [1] : vector<16x256xf32> to vector<16xf32>
    %25 = vector.shape_cast %24 : vector<16xf32> to vector<16x1xf32>
    %cst_23 = arith.constant 3.906250e-03 : f32
    %26 = vector.broadcast %cst_23 : f32 to vector<16x1xf32>
    %27 = arith.mulf %25, %26 : vector<16x1xf32>
    %28 = vector.broadcast %27 : vector<16x1xf32> to vector<16x256xf32>
    %29 = arith.subf %23, %28 : vector<16x256xf32>
    %30 = arith.mulf %29, %29 : vector<16x256xf32>
    %cst_24 = arith.constant dense<0.000000e+00> : vector<16xf32>
    %31 = vector.multi_reduction <add>, %30, %cst_24 [1] : vector<16x256xf32> to vector<16xf32>
    %32 = vector.shape_cast %31 : vector<16xf32> to vector<16x1xf32>
    %cst_25 = arith.constant 3.906250e-03 : f32
    %33 = vector.broadcast %cst_25 : f32 to vector<16x1xf32>
    %34 = arith.mulf %32, %33 : vector<16x1xf32>
    %cst_26 = arith.constant 9.99999974E-6 : f32
    %35 = vector.broadcast %cst_26 : f32 to vector<16x1xf32>
    %36 = arith.addf %34, %35 : vector<16x1xf32>
    %37 = math.rsqrt %36 : vector<16x1xf32>
    %38 = arith.mulf %8, %37 : vector<16x1xf32>
    %39 = vector.broadcast %38 : vector<16x1xf32> to vector<16x256xf32>
    %40 = arith.mulf %29, %39 : vector<16x256xf32>
    %41 = vector.broadcast %9 : vector<16x1xf32> to vector<16x256xf32>
    %42 = arith.addf %40, %41 : vector<16x256xf32>
    %43 = tpu.iota {dimensions = array<i32: 1>} : vector<1x256xi32>
    %c16_i32 = arith.constant 16 : i32
    %c0_i32 = arith.constant 0 : i32
    %44 = arith.cmpi eq, %c16_i32, %c0_i32 : i32
    %c1_i32 = arith.constant 1 : i32
    %45 = arith.select %44, %c1_i32, %c16_i32 : i32
    %46 = vector.broadcast %45 : i32 to vector<1x256xi32>
    %47 = arith.remsi %43, %46 : vector<1x256xi32>
    %c0_i32_27 = arith.constant 0 : i32
    %48 = vector.broadcast %c0_i32_27 : i32 to vector<1x256xi32>
    %49 = arith.cmpi ne, %47, %48 : vector<1x256xi32>
    %c0_i32_28 = arith.constant 0 : i32
    %50 = vector.broadcast %c0_i32_28 : i32 to vector<1x256xi32>
    %51 = arith.cmpi slt, %47, %50 : vector<1x256xi32>
    %c0_i32_29 = arith.constant 0 : i32
    %52 = arith.cmpi slt, %45, %c0_i32_29 : i32
    %53 = vector.broadcast %52 : i1 to vector<1x256xi1>
    %54 = vector.broadcast %53 : vector<1x256xi1> to vector<1x256xi1>
    %55 = arith.xori %51, %54 : vector<1x256xi1>
    %56 = arith.andi %55, %49 : vector<1x256xi1>
    %57 = vector.broadcast %45 : i32 to vector<1x256xi32>
    %58 = arith.addi %47, %57 : vector<1x256xi32>
    %59 = arith.select %56, %58, %47 : vector<1x256xi1>, vector<1x256xi32>
    %c1_i32_30 = arith.constant 1 : i32
    %60 = vector.broadcast %c1_i32_30 : i32 to vector<1x256xi32>
    %61 = arith.cmpi sge, %59, %60 : vector<1x256xi32>
    %62 = arith.extui %61 : vector<1x256xi1> to vector<1x256xi32>
    %63 = arith.sitofp %62 : vector<1x256xi32> to vector<1x256xf32>
    %c14_i32 = arith.constant 14 : i32
    %64 = vector.broadcast %c14_i32 : i32 to vector<1x256xi32>
    %65 = arith.cmpi sle, %59, %64 : vector<1x256xi32>
    %66 = arith.extui %65 : vector<1x256xi1> to vector<1x256xi32>
    %67 = arith.sitofp %66 : vector<1x256xi32> to vector<1x256xf32>
    %cst_31 = arith.constant 0.000000e+00 : f32
    %68 = vector.broadcast %cst_31 : f32 to vector<16x17xf32>
    %69 = vector.extract_strided_slice %0 {offsets = [0, 0], sizes = [16, 239], strides = [1, 1]} : vector<16x256xf32> to vector<16x239xf32>
    %70 = tpu.concatenate %68, %69 in 1 : vector<16x17xf32>, vector<16x239xf32> -> vector<16x256xf32>
    %71 = vector.broadcast %63 : vector<1x256xf32> to vector<16x256xf32>
    %72 = arith.mulf %70, %71 : vector<16x256xf32>
    %cst_32 = arith.constant 0.000000e+00 : f32
    %73 = vector.broadcast %cst_32 : f32 to vector<16x16xf32>
    %74 = vector.extract_strided_slice %0 {offsets = [0, 0], sizes = [16, 240], strides = [1, 1]} : vector<16x256xf32> to vector<16x240xf32>
    %75 = tpu.concatenate %73, %74 in 1 : vector<16x16xf32>, vector<16x240xf32> -> vector<16x256xf32>
    %cst_33 = arith.constant 0.000000e+00 : f32
    %76 = vector.broadcast %cst_33 : f32 to vector<16x15xf32>
    %77 = vector.extract_strided_slice %0 {offsets = [0, 0], sizes = [16, 241], strides = [1, 1]} : vector<16x256xf32> to vector<16x241xf32>
    %78 = tpu.concatenate %76, %77 in 1 : vector<16x15xf32>, vector<16x241xf32> -> vector<16x256xf32>
    %79 = vector.broadcast %67 : vector<1x256xf32> to vector<16x256xf32>
    %80 = arith.mulf %78, %79 : vector<16x256xf32>
    %cst_34 = arith.constant 0.000000e+00 : f32
    %81 = vector.broadcast %cst_34 : f32 to vector<16x1xf32>
    %82 = vector.extract_strided_slice %0 {offsets = [0, 0], sizes = [16, 255], strides = [1, 1]} : vector<16x256xf32> to vector<16x255xf32>
    %83 = tpu.concatenate %81, %82 in 1 : vector<16x1xf32>, vector<16x255xf32> -> vector<16x256xf32>
    %84 = vector.broadcast %63 : vector<1x256xf32> to vector<16x256xf32>
    %85 = arith.mulf %83, %84 : vector<16x256xf32>
    %cst_35 = arith.constant 0.000000e+00 : f32
    %86 = vector.broadcast %cst_35 : f32 to vector<16x1xf32>
    %87 = vector.extract_strided_slice %0 {offsets = [0, 1], sizes = [16, 255], strides = [1, 1]} : vector<16x256xf32> to vector<16x255xf32>
    %88 = tpu.concatenate %87, %86 in 1 : vector<16x255xf32>, vector<16x1xf32> -> vector<16x256xf32>
    %89 = vector.broadcast %67 : vector<1x256xf32> to vector<16x256xf32>
    %90 = arith.mulf %88, %89 : vector<16x256xf32>
    %cst_36 = arith.constant 0.000000e+00 : f32
    %91 = vector.broadcast %cst_36 : f32 to vector<16x15xf32>
    %92 = vector.extract_strided_slice %0 {offsets = [0, 15], sizes = [16, 241], strides = [1, 1]} : vector<16x256xf32> to vector<16x241xf32>
    %93 = tpu.concatenate %92, %91 in 1 : vector<16x241xf32>, vector<16x15xf32> -> vector<16x256xf32>
    %94 = vector.broadcast %63 : vector<1x256xf32> to vector<16x256xf32>
    %95 = arith.mulf %93, %94 : vector<16x256xf32>
    %cst_37 = arith.constant 0.000000e+00 : f32
    %96 = vector.broadcast %cst_37 : f32 to vector<16x16xf32>
    %97 = vector.extract_strided_slice %0 {offsets = [0, 16], sizes = [16, 240], strides = [1, 1]} : vector<16x256xf32> to vector<16x240xf32>
    %98 = tpu.concatenate %97, %96 in 1 : vector<16x240xf32>, vector<16x16xf32> -> vector<16x256xf32>
    %cst_38 = arith.constant 0.000000e+00 : f32
    %99 = vector.broadcast %cst_38 : f32 to vector<16x17xf32>
    %100 = vector.extract_strided_slice %0 {offsets = [0, 17], sizes = [16, 239], strides = [1, 1]} : vector<16x256xf32> to vector<16x239xf32>
    %101 = tpu.concatenate %100, %99 in 1 : vector<16x239xf32>, vector<16x17xf32> -> vector<16x256xf32>
    %102 = vector.broadcast %67 : vector<1x256xf32> to vector<16x256xf32>
    %103 = arith.mulf %101, %102 : vector<16x256xf32>
    %104 = tpu.concatenate %72, %75, %80, %85, %0, %90, %95, %98, %103 in 0 : vector<16x256xf32>, vector<16x256xf32>, vector<16x256xf32>, vector<16x256xf32>, vector<16x256xf32>, vector<16x256xf32>, vector<16x256xf32>, vector<16x256xf32>, vector<16x256xf32> -> vector<144x256xf32>
    %cst_39 = arith.constant dense<0.000000e+00> : vector<16x256xf32>
    %105 = tpu.matmul %4, %104, %cst_39 {dimension_numbers = #tpu.dot_dimension_numbers<[1], [0], [0], [1], [0, 0, 1, 1], [], []>} : vector<16x144xf32>, vector<144x256xf32>, vector<16x256xf32> -> vector<16x256xf32>
    %106 = vector.broadcast %7 : vector<16x1xf32> to vector<16x256xf32>
    %107 = arith.addf %105, %106 : vector<16x256xf32>
    %cst_40 = arith.constant dense<0.000000e+00> : vector<16xf32>
    %108 = vector.multi_reduction <add>, %42, %cst_40 [1] : vector<16x256xf32> to vector<16xf32>
    %109 = vector.shape_cast %108 : vector<16xf32> to vector<16x1xf32>
    %cst_41 = arith.constant 3.906250e-03 : f32
    %110 = vector.broadcast %cst_41 : f32 to vector<16x1xf32>
    %111 = arith.mulf %109, %110 : vector<16x1xf32>
    %cst_42 = arith.constant dense<0.000000e+00> : vector<16xf32>
    %112 = vector.multi_reduction <add>, %107, %cst_42 [1] : vector<16x256xf32> to vector<16xf32>
    %113 = vector.shape_cast %112 : vector<16xf32> to vector<16x1xf32>
    %cst_43 = arith.constant 3.906250e-03 : f32
    %114 = vector.broadcast %cst_43 : f32 to vector<16x1xf32>
    %115 = arith.mulf %113, %114 : vector<16x1xf32>
    %116 = vector.shape_cast %111 : vector<16x1xf32> to vector<1x16x1xf32>
    %cst_44 = arith.constant dense<0xFF800000> : vector<1xf32>
    %117 = vector.multi_reduction <maximumf>, %116, %cst_44 [1, 2] : vector<1x16x1xf32> to vector<1xf32>
    %118 = vector.shape_cast %117 : vector<1xf32> to vector<1x1x1xf32>
    %119 = vector.extract %118[0, 0, 0] : f32 from vector<1x1x1xf32>
    %120 = vector.broadcast %119 : f32 to vector<16x1xf32>
    %121 = arith.subf %111, %120 : vector<16x1xf32>
    %122 = math.exp %121 : vector<16x1xf32>
    %123 = vector.shape_cast %115 : vector<16x1xf32> to vector<1x16x1xf32>
    %cst_45 = arith.constant dense<0xFF800000> : vector<1xf32>
    %124 = vector.multi_reduction <maximumf>, %123, %cst_45 [1, 2] : vector<1x16x1xf32> to vector<1xf32>
    %125 = vector.shape_cast %124 : vector<1xf32> to vector<1x1x1xf32>
    %126 = vector.extract %125[0, 0, 0] : f32 from vector<1x1x1xf32>
    %127 = vector.broadcast %126 : f32 to vector<16x1xf32>
    %128 = arith.subf %115, %127 : vector<16x1xf32>
    %129 = math.exp %128 : vector<16x1xf32>
    %130 = tpu.concatenate %122, %129 in 1 : vector<16x1xf32>, vector<16x1xf32> -> vector<16x2xf32>
    %cst_46 = arith.constant dense<0.000000e+00> : vector<16x2xf32>
    %131 = tpu.matmul %5, %130, %cst_46 {dimension_numbers = #tpu.dot_dimension_numbers<[1], [0], [0], [1], [0, 0, 1, 1], [], []>} : vector<16x16xf32>, vector<16x2xf32>, vector<16x2xf32> -> vector<16x2xf32>
    %132 = vector.extract_strided_slice %131 {offsets = [0, 0], sizes = [16, 1], strides = [1, 1]} : vector<16x2xf32> to vector<16x1xf32>
    %133 = arith.divf %122, %132 : vector<16x1xf32>
    %134 = vector.extract_strided_slice %131 {offsets = [0, 1], sizes = [16, 1], strides = [1, 1]} : vector<16x2xf32> to vector<16x1xf32>
    %135 = arith.divf %129, %134 : vector<16x1xf32>
    %136 = vector.broadcast %133 : vector<16x1xf32> to vector<16x256xf32>
    %137 = arith.mulf %136, %107 : vector<16x256xf32>
    %138 = vector.broadcast %135 : vector<16x1xf32> to vector<16x256xf32>
    %139 = arith.mulf %138, %42 : vector<16x256xf32>
    %140 = arith.addf %137, %139 : vector<16x256xf32>
    %cst_47 = arith.constant dense<0.000000e+00> : vector<16x256xf32>
    %141 = tpu.matmul %5, %140, %cst_47 {dimension_numbers = #tpu.dot_dimension_numbers<[1], [0], [0], [1], [0, 0, 1, 1], [], []>} : vector<16x16xf32>, vector<16x256xf32>, vector<16x256xf32> -> vector<16x256xf32>
    %142 = arith.negf %141 : vector<16x256xf32>
    %143 = math.exp %142 : vector<16x256xf32>
    %cst_48 = arith.constant 1.000000e+00 : f32
    %144 = vector.broadcast %cst_48 : f32 to vector<16x256xf32>
    %145 = arith.addf %144, %143 : vector<16x256xf32>
    %146 = arith.divf %144, %145 : vector<16x256xf32>
    %147 = arith.mulf %0, %146 : vector<16x256xf32>
    %c0_49 = arith.constant 0 : index
    %c0_50 = arith.constant 0 : index
    %148 = vector.load %arg11[%c0_49, %c0_50] : memref<16x256xf32, #tpu.memory_space<vmem>>, vector<16x256xf32>
    tpu.vector_store %arg11[%c0_49, %c0_50], %147 {strides = array<i32>} : memref<16x256xf32, #tpu.memory_space<vmem>>, vector<16x256xf32>,
    return
  }
  func.func @transform_0(%arg0: i32) -> (i32, i32) {
    %c0_i32 = arith.constant 0 : i32
    %c0_i32_0 = arith.constant 0 : i32
    return %arg0, %c0_i32 : i32, i32
  }
  func.func @transform_1(%arg0: i32) -> (i32, i32) {
    %c0_i32 = arith.constant 0 : i32
    %c0_i32_0 = arith.constant 0 : i32
    %c0_i32_1 = arith.constant 0 : i32
    return %c0_i32, %c0_i32_0 : i32, i32
  }
  func.func @transform_2(%arg0: i32) -> (i32, i32) {
    %c0_i32 = arith.constant 0 : i32
    %c0_i32_0 = arith.constant 0 : i32
    %c0_i32_1 = arith.constant 0 : i32
    return %c0_i32, %c0_i32_0 : i32, i32
  }
  func.func @transform_3(%arg0: i32) -> (i32, i32) {
    %c0_i32 = arith.constant 0 : i32
    %c0_i32_0 = arith.constant 0 : i32
    %c0_i32_1 = arith.constant 0 : i32
    return %c0_i32, %c0_i32_0 : i32, i32
  }
  func.func @transform_4(%arg0: i32) -> (i32, i32) {
    %c0_i32 = arith.constant 0 : i32
    %c0_i32_0 = arith.constant 0 : i32
    %c0_i32_1 = arith.constant 0 : i32
    return %c0_i32, %c0_i32_0 : i32, i32
  }
  func.func @transform_5(%arg0: i32) -> (i32, i32) {
    %c0_i32 = arith.constant 0 : i32
    %c0_i32_0 = arith.constant 0 : i32
    %c0_i32_1 = arith.constant 0 : i32
    return %c0_i32, %c0_i32_0 : i32, i32
  }
  func.func @transform_6(%arg0: i32) -> (i32, i32) {
    %c0_i32 = arith.constant 0 : i32
    %c0_i32_0 = arith.constant 0 : i32
    %c0_i32_1 = arith.constant 0 : i32
    return %c0_i32, %c0_i32_0 : i32, i32
  }
  func.func @transform_7(%arg0: i32) -> (i32, i32) {
    %c0_i32 = arith.constant 0 : i32
    %c0_i32_0 = arith.constant 0 : i32
    %c0_i32_1 = arith.constant 0 : i32
    return %c0_i32, %c0_i32_0 : i32, i32
  }
  func.func @transform_8(%arg0: i32) -> (i32, i32) {
    %c0_i32 = arith.constant 0 : i32
    %c0_i32_0 = arith.constant 0 : i32
    %c0_i32_1 = arith.constant 0 : i32
    return %c0_i32, %c0_i32_0 : i32, i32
  }
  func.func @transform_9(%arg0: i32) -> (i32, i32) {
    %c0_i32 = arith.constant 0 : i32
    %c0_i32_0 = arith.constant 0 : i32
    %c0_i32_1 = arith.constant 0 : i32
    return %c0_i32, %c0_i32_0 : i32, i32
  }
  func.func @transform_10(%arg0: i32) -> (i32, i32) {
    %c0_i32 = arith.constant 0 : i32
    %c0_i32_0 = arith.constant 0 : i32
    return %arg0, %c0_i32 : i32, i32
  }
}

</mosaic_0001>

<bundles_post_ra>
// kernel: tpu_custom_call.1
= control target key start
LH: loop header
LB: loop body
LE: loop exit
PB: predicated region body
PF: predicated region fallthrough
CT: control target
= control target key end

     0   :  { %15 = vsyncpa [#allocation3], 0  ;;  %s2422_s0 = inlined_call_operand.vmem [shape: f32[32,256], index: 0, kind: input, shape index: {}]   ;;  %s2423_s1 = inlined_call_operand.vmem [shape: f32[256,32], index: 1, kind: input, shape index: {}]   ;;  %s2424_s2 = inlined_call_operand.vmem [shape: f32[32,512], index: 2, kind: input, shape index: {}]   ;;  %s2425_s3 = inlined_call_operand.vmem [shape: f32[16,16], index: 3, kind: input, shape index: {}]   ;;  %s2426_s4 = inlined_call_operand.vmem [shape: f32[16,1], index: 4, kind: input, shape index: {}]   ;;  %s2427_s5 = inlined_call_operand.vmem [shape: f32[16,144], index: 5, kind: input, shape index: {}]   ;;  %s2428_s6 = inlined_call_operand.vmem [shape: f32[16,1], index: 6, kind: input, shape index: {}]   ;;  %s2429_s7 = inlined_call_operand.vmem [shape: f32[16,16], index: 7, kind: input, shape index: {}]   ;;  %s2430_s8 = inlined_call_operand.vmem [shape: f32[16,1], index: 8, kind: input, shape index: {}]   ;;  %s2431_s9 = inlined_call_operand.vmem [shape: f32[16,1], index: 9, kind: input, shape index: {}]   ;;  %s2432_s10 = inlined_call_operand.hbm [shape: f32[32,256], index: 10, kind: output, shape index: {}]  }
   0x1   :  { %17 = vsyncpa [#allocation3 + $0x1], 0  ;;  %s1941_s13 = smov 0   ;;  %s1943_s14 = smov 0  }
   0x2   :  { %s1945_s15 = smov 0   ;;  %s1947_s16 = smov 0  }
   0x3 LB: > { %2434 = sst [smem:[#allocation5_spill]] %s1867_s15  ;;  %s1962_s17 = sadd.s32 4294967295, %s1871_s16   ;;  %s1871_s16 = sphi %s1947_s16, %s2444_s16   ;;  %s1867_s15 = sphi %s1945_s15, %s2441_s15   ;;  %s1863_s14 = sphi %s1943_s14, %s2443_s14   ;;  %s1859_s13 = sphi %s1941_s13, %s2442_s13  }
   0x4   : > { %s1486_s18 = sadd.s32 4294967294, %s1871_s16   ;;  %s1966_s19 = sadd.s32 1, %s1871_s16  }
   0x5   : > { %s245_s20 = sadd.s32 1, %s1867_s15  ;;  %s242_s21 = ssub.s32 %s1871_s16, %s1966_s19 }
   0x6   : > { %p255_p0 = scmp.ne.s32.totalorder %s1867_s15, %s1863_s14  ;;  %p243_p1 = scmp.eq.s32.totalorder %s242_s21, 0 }
   0x7   : > { %p256_p2 = scmp.eq.s32.totalorder %s1962_s17, 1  ;;  %p261_p3 = scmp.ne.s32.totalorder %s1863_s14, %s1859_s13 }
   0x8   : > { %p262_p4 = scmp.eq.s32.totalorder %s1486_s18, 1  ;;  %p1489_p7 = scmp.ge.s32.totalorder %s1871_s16, 1 }
   0x9   : > { %s1977_s22 = scalar_select %p243_p1, %s1867_s15, %s245_s20  }
   0xa   : > { %p1979_p5 = por %p256_p2, %p255_p0  ;;  %p1983_p6 = por %p262_p4, %p261_p3 }
   0xb   : > { %2435 = sst [smem:[#allocation6_spill]] %s1977_s22  ;;  %p317_p8 = scmp.lt.s32.totalorder %s1871_s16, 3 }
   0xd   : > { %p318_p9 = pnand %p1489_p7, %p317_p8 }
   0xe   : > { %v384_v0 = vld [vmem:[%s2423_s1 + $0x80] sm:$0xff] (!%p318_p9)  ;;  %v385_v1 = vld [vmem:[%s2423_s1 + $0x88] sm:$0xff] (!%p318_p9)  ;;  %s1491_s11 = sshll.u32 (!%p318_p9), %s1962_s17, 1  ;;  %v386_v5 = vld [vmem:[%s2423_s1 + $0x90] sm:$0xff] (!%p318_p9)  ;;  %vm517_vm0 = vcmask (!%p318_p9), 130048   ;;  %v1873_v54 = vmov (!%p318_p9), 0  }
   0xf   : > { %321 = sbr.rel (%p318_p9) target bundleno = 2058 (0x80a), region = 60  ;;  %v368_v2 = vld [vmem:[%s2423_s1] sm:$0xff] (!%p318_p9)  ;;  %v1591_v3 = vpack.c.bf16 (!%p318_p9), %v385_v1, %v384_v0  ;;  %v369_v4 = vld [vmem:[%s2423_s1 + $0x8] sm:$0xff] (!%p318_p9)  ;;  %v387_v6 = vld [vmem:[%s2423_s1 + $0x98] sm:$0xff] (!%p318_p9)  ;;  %p357_p10 = scmp.lt.s32.totalorder (!%p318_p9), %s1491_s11, 3  ;;  %1744 = vset.pattern.permute.xlu0 (!%p318_p9), %v1873_v54  ;;  %1765 = vset.pattern.permute.xlu1 (!%p318_p9), %v1873_v54  ;;  %vm611_vm1 = vcmask (!%p318_p9), 261120  }
  0x10   : > { %v1593_v7 = vpack.c.bf16 (!%p318_p9), %v369_v4, %v368_v2  ;;  %v1595_v8 = vpack.c.bf16 (!%p318_p9), %v387_v6, %v386_v5  ;;  %v370_v9 = vld [vmem:[%s2423_s1 + $0x10] sm:$0xff] (!%p318_p9)  ;;  %v371_v10 = vld [vmem:[%s2423_s1 + $0x18] sm:$0xff] (!%p318_p9)  ;;  %v388_v11 = vld [vmem:[%s2423_s1 + $0xa0] sm:$0xff] (!%p318_p9)  ;;  %s1875_s28 = smov (!%p318_p9), 17   ;;  %s1876_s30 = smov (!%p318_p9), 16   ;;  %vm889_vm2 = vcmask (!%p318_p9), 138240  }
  0x11   : > { %1592 = vmatprep.subr.bf16.mxu0 (!%p318_p9), %v1591_v3  ;;  %v389_v12 = vld [vmem:[%s2423_s1 + $0xa8] sm:$0xff] (!%p318_p9)  ;;  %v1597_v13 = vpack.c.bf16 (!%p318_p9), %v371_v10, %v370_v9  ;;  %v372_v15 = vld [vmem:[%s2423_s1 + $0x20] sm:$0xff] (!%p318_p9)  ;;  %v390_v17 = vld [vmem:[%s2423_s1 + $0xb0] sm:$0xff] (!%p318_p9)  ;;  %s1877_s22 = smov (!%p318_p9), 15   ;;  %s1879_s12 = smov (!%p318_p9), 127   ;;  %vm926_vm5 = vcmask (!%p318_p9), 121856  }
  0x12   : > { %1594 = vmatpush3.bf16.msra.mxu0 (!%p318_p9), %v1593_v7  ;;  %v1599_v14 = vpack.c.bf16 (!%p318_p9), %v389_v12, %v388_v11  ;;  %v373_v16 = vld [vmem:[%s2423_s1 + $0x28] sm:$0xff] (!%p318_p9)  ;;  %v391_v18 = vld [vmem:[%s2423_s1 + $0xb8] sm:$0xff] (!%p318_p9)  ;;  %v374_v21 = vld [vmem:[%s2423_s1 + $0x30] sm:$0xff] (!%p318_p9)  ;;  %v1874_v7 = vmov (!%p318_p9), 0.0   ;;  %s1880_s18 = smov (!%p318_p9), 113   ;;  %s1881_s20 = smov (!%p318_p9), 112  }
  0x13   : > { %1596 = vmatprep.subr.bf16.mxu0 (!%p318_p9), %v1595_v8  ;;  %v1601_v19 = vpack.c.bf16 (!%p318_p9), %v373_v16, %v372_v15  ;;  %v1603_v20 = vpack.c.bf16 (!%p318_p9), %v391_v18, %v390_v17  ;;  %v375_v22 = vld [vmem:[%s2423_s1 + $0x38] sm:$0xff] (!%p318_p9)  ;;  %v392_v23 = vld [vmem:[%s2423_s1 + $0xc0] sm:$0xff] (!%p318_p9)  ;;  %v393_v24 = vld [vmem:[%s2423_s1 + $0xc8] sm:$0xff] (!%p318_p9)  ;;  %682 = vmatprep.mubr.f32.mxu1 (!%p318_p9), %v1874_v7  ;;  %s1882_s21 = smov (!%p318_p9), 111   ;;  %vm947_vm10 = vcmask (!%p318_p9), 7168   ;;  %vm968_vm11 = vcmask (!%p318_p9), 1039360  }
  0x14   : > { %v1605_v26 = vpack.c.bf16 (!%p318_p9), %v375_v22, %v374_v21  ;;  %v1607_v27 = vpack.c.bf16 (!%p318_p9), %v393_v24, %v392_v23  ;;  %v376_v28 = vld [vmem:[%s2423_s1 + $0x40] sm:$0xff] (!%p318_p9)  ;;  %v377_v29 = vld [vmem:[%s2423_s1 + $0x48] sm:$0xff] (!%p318_p9)  ;;  %v394_v30 = vld [vmem:[%s2423_s1 + $0xd0] sm:$0xff] (!%p318_p9)  ;;  %vm989_vm12 = vcmask (!%p318_p9), 924672   ;;  %vm1027_vm13 = vcmask (!%p318_p9), 908288  }
  0x15   : > { %v395_v31 = vld [vmem:[%s2423_s1 + $0xd8] sm:$0xff] (!%p318_p9)  ;;  %v1609_v32 = vpack.c.bf16 (!%p318_p9), %v377_v29, %v376_v28  ;;  %v378_v34 = vld [vmem:[%s2423_s1 + $0x50] sm:$0xff] (!%p318_p9)  ;;  %v396_v36 = vld [vmem:[%s2423_s1 + $0xe0] sm:$0xff] (!%p318_p9)  ;;  %vm1010_vm14 = vcmask (!%p318_p9), 916480  }
  0x16   : > { %s2446_s11 = smov (!%p357_p10, %s1491_s11), 3  ;;  %1598 = vmatpush3.bf16.msra.mxu0 %v1597_v13  ;;  %v1611_v33 = vpack.c.bf16 %v395_v31, %v394_v30  ;;  %v379_v35 = vld [vmem:[%s2423_s1 + $0x58] sm:$0xff]  ;;  %v397_v37 = vld [vmem:[%s2423_s1 + $0xe8] sm:$0xff]  ;;  %v380_v40 = vld [vmem:[%s2423_s1 + $0x60] sm:$0xff] }
  0x17   : > { %s1528_s29 = sshll.u32 %s2446_s11, 4  ;;  %1600 = vmatprep.subr.bf16.mxu0 %v1599_v14  ;;  %v1613_v38 = vpack.c.bf16 %v379_v35, %v378_v34  ;;  %v1615_v39 = vpack.c.bf16 %v397_v37, %v396_v36  ;;  %v381_v41 = vld [vmem:[%s2423_s1 + $0x68] sm:$0xff]  ;;  %v398_v42 = vld [vmem:[%s2423_s1 + $0xf0] sm:$0xff]  ;;  %v399_v43 = vld [vmem:[%s2423_s1 + $0xf8] sm:$0xff] }
  0x18   : > { %s2035_s15 = scalar_lea.vmem %s2422_s0, %s1528_s29  ;;  %v1617_v44 = vpack.c.bf16 %v381_v41, %v380_v40  ;;  %v1619_v45 = vpack.c.bf16 %v399_v43, %v398_v42  ;;  %v382_v46 = vld [vmem:[%s2423_s1 + $0x70] sm:$0xff]  ;;  %v383_v47 = vld [vmem:[%s2423_s1 + $0x78] sm:$0xff]  ;;  %v416_v52 = vld [vmem:[%s2425_s3] sm:$0xff]  ;;  %s1878_s29 = smov 1   ;;  %v838_v42 = vlaneseq }
  0x19   : > { %v2050_v25 = vld [vmem:[%s2035_s15 + $0x8] sm:$0xff]  ;;  %v1621_v48 = vpack.c.bf16 %v383_v47, %v382_v46  ;;  %v2096_v49 = vld [vmem:[%s2035_s15] sm:$0xff]  ;;  %v2099_v50 = vld [vmem:[%s2035_s15 + $0x18] sm:$0xff] }
  0x1a   : > { %496 = vmatprep.mubr.f32.mxu0 %v2050_v25  ;;  %1602 = vmatpush3.bf16.msra.mxu0 %v1601_v19  ;;  %v2104_v51 = vld [vmem:[%s2035_s15 + $0x10] sm:$0xff]  ;;  %v424_v53 = vld [vmem:[%s2426_s4] sm:$0xff]  ;;  %v425_v55 = vld [vmem:[%s2426_s4 + $0x8] sm:$0xff]  ;;  %v1745_v16 = vpack.i.bf16 %v2050_v25, %v2096_v49 }
  0x1b   : > { %1604 = vmatprep.subr.bf16.mxu0 %v1603_v20  ;;  %509 = vperm.xlu0 %1744, %v424_v53   ;;  %v417_v63 = vld [vmem:[%s2425_s3 + $0x8] sm:$0xff]  ;;  %v400_v2 = vld [vmem:[%s2424_s2] sm:$0xff]  ;;  %v403_v13 = vld [vmem:[%s2424_s2 + $0x18] sm:$0xff]  ;;  %v1750_v17 = vpack.i.bf16 %v2099_v50, %v2104_v51 }
  0x1c   : > { %v401_v0 = vld [vmem:[%s2424_s2 + $0x8] sm:$0xff]  ;;  %v404_v4 = vld [vmem:[%s2424_s2 + $0x20] sm:$0xff]  ;;  %v407_v14 = vld [vmem:[%s2424_s2 + $0x38] sm:$0xff]  ;;  %881 = vrot.lane.b32.xlu1 %v2096_v49, %s1875_s28 }
  0x1d   : > { %v405_v1 = vld [vmem:[%s2424_s2 + $0x28] sm:$0xff]  ;;  %v1629_v8 = vpack.c.bf16 %v404_v4, %v400_v2  ;;  %v408_v10 = vld [vmem:[%s2424_s2 + $0x40] sm:$0xff]  ;;  %v1635_v15 = vpack.c.bf16 %v407_v14, %v403_v13  ;;  %v402_v31 = vld [vmem:[%s2424_s2 + $0x10] sm:$0xff] }
  0x1e   : > { %1606 = vmatpush3.bf16.msra.mxu0 %v1605_v26  ;;  %v1627_v3 = vpack.c.bf16 %v405_v1, %v401_v0  ;;  %v409_v5 = vld [vmem:[%s2424_s2 + $0x48] sm:$0xff]  ;;  %v412_v11 = vld [vmem:[%s2424_s2 + $0x60] sm:$0xff]  ;;  %v415_v34 = vld [vmem:[%s2424_s2 + $0x78] sm:$0xff] }
  0x1f   : > { %1608 = vmatprep.subr.bf16.mxu0 %v1607_v27  ;;  %514 = vperm.xlu0 %1744, %v425_v55   ;;  %v413_v6 = vld [vmem:[%s2424_s2 + $0x68] sm:$0xff]  ;;  %v1633_v12 = vpack.c.bf16 %v412_v11, %v408_v10  ;;  %v410_v37 = vld [vmem:[%s2424_s2 + $0x50] sm:$0xff]  ;;  %vm2223_vm7 = vmneg %vm517_vm0 }
  0x20   : > { %v1631_v9 = vpack.c.bf16 %v413_v6, %v409_v5  ;;  %1628 = vmatprep.subr.bf16.mxu1 %v1627_v3  ;;  %883 = vrot.lane.b32.xlu1 %v2050_v25, %s1875_s28  ;;  %vm1650_vm9 = vmpackc.low %vm2223_vm7, %vm2223_vm7 }
  0x21   : > { %1630 = vmatpush1.bf16.msra.mxu1 %v1629_v8  ;;  %vm1673_vm15 = vmpackc.low %vm1010_vm14, %vm1010_vm14 }
  0x22   : > { %1610 = vmatpush3.bf16.msra.mxu0 %v1609_v32  ;;  %1632 = vmatprep.subr.bf16.mxu1 %v1631_v9  ;;  %v406_v32 = vld [vmem:[%s2424_s2 + $0x30] sm:$0xff] }
  0x23   : > { %1612 = vmatprep.subr.bf16.mxu0 %v1611_v33  ;;  %885 = vrot.lane.b32.xlu0 %v2104_v51, %s1875_s28  ;;  %v411_v33 = vld [vmem:[%s2424_s2 + $0x58] sm:$0xff]  ;;  %v1637_v35 = vpack.c.bf16 %v406_v32, %v402_v31 }
  0x24   : > { %887 = vrot.lane.b32.xlu1 %v2099_v50, %s1875_s28  ;;  %v1639_v36 = vpack.c.bf16 %v415_v34, %v411_v33 }
  0x25   : > { %1634 = vmatpush1.bf16.msra.mxu1 %v1633_v12 }
  0x26   : > { %1614 = vmatpush3.bf16.msra.mxu0 %v1613_v38  ;;  %1636 = vmatprep.subr.bf16.mxu1 %v1635_v15  ;;  %v414_v38 = vld [vmem:[%s2424_s2 + $0x70] sm:$0xff] }
  0x27   : > { %1616 = vmatprep.subr.bf16.mxu0 %v1615_v39  ;;  %1746 = vrot.lane.b32.xlu0 %v1745_v16, %s1876_s30  ;;  %v1641_v40 = vpack.c.bf16 %v414_v38, %v410_v37 }
  0x28   : > { %1751 = vrot.lane.b32.xlu1 %v1750_v17, %s1876_s30 }
  0x2a   : > { %1618 = vmatpush3.bf16.msra.mxu0 %v1617_v44 }
  0x2b   : > { %1620 = vmatprep.subr.bf16.mxu0 %v1619_v45  ;;  %918 = vrot.lane.b32.xlu0 %v2096_v49, %s1877_s22  ;;  %v839_v45 = vand.u32 127, %v838_v42 }
  0x2c   : > { %920 = vrot.lane.b32.xlu1 %v2050_v25, %s1877_s22 }
  0x2d   : > { %v845_v46 = vand.u32 15, %v839_v45  ;;  %v840_v47 = vadd.s32 128, %v839_v45 }
  0x2e   : > { %1622 = vmatpush3.bf16.msra.mxu0 %v1621_v48 }
  0x2f   : > { %922 = vrot.lane.b32.xlu0 %v2104_v51, %s1877_s22  ;;  %vm865_vm3 = vcmp.ge.s32.totalorder %v845_v46, 1  ;;  %v852_v55 = vand.u32 15, %v840_v47  ;;  %vm871_vm6 = vcmp.le.s32.totalorder %v845_v46, 14 }
  0x30   : > { %924 = vrot.lane.b32.xlu1 %v2099_v50, %s1877_s22  ;;  %v2229_v15 = vsel %vm871_vm6, 1.0, %v1874_v7  ;;  %s353_s22 = sand.u32 1, %s1863_s14  }
  0x31   : > { %497 = vmatmul.mubr.f32.vlgmr.msra.gmra.mrb[0].mxu0 %v2096_v49  ;;  %vm866_vm4 = vcmp.ge.s32.totalorder %v852_v55, 1  ;;  %vm872_vm8 = vcmp.le.s32.totalorder %v852_v55, 14 }
  0x32   : > { %501 = vmatprep.mubr.f32.mxu0 %v2099_v50 }
  0x33   : > { %939 = vrot.lane.b32.xlu0 %v2096_v49, %s1878_s29 }
  0x34   : > { %941 = vrot.lane.b32.xlu1 %v2050_v25, %s1878_s29 }
  0x35   : > { %502 = vmatmul.mubr.f32.gmra.mrb[2].mxu0 %v2104_v51 }
  0x36   : > { %1581 = vmatprep.mubr.msk.f32.mxu0 %vm517_vm0, %v416_v52 }
  0x37   : > { %943 = vrot.lane.b32.xlu0 %v2104_v51, %s1878_s29 }
  0x38   : > { %945 = vrot.lane.b32.xlu1 %v2099_v50, %s1878_s29  ;;  %s1490_s29 = sshll.u32 %s353_s22, 5 }
  0x3b   : > { %962 = vrot.lane.b32.xlu0 %v2050_v25, %s1879_s12 }
  0x3c   : > { %966 = vrot.lane.b32.xlu1 %v2099_v50, %s1879_s12 }
  0x3f   : > { %960 = vrot.lane.b32.xlu0 %v2096_v49, %s1879_s12 }
  0x40   : > { %964 = vrot.lane.b32.xlu1 %v2104_v51, %s1879_s12  ;;  %s1530_s12 = sshll.u32 %s1962_s17, 9 }
  0x43   : > { %983 = vrot.lane.b32.xlu0 %v2050_v25, %s1880_s18 }
  0x44   : > { %987 = vrot.lane.b32.xlu1 %v2099_v50, %s1880_s18 }
  0x47   : > { %981 = vrot.lane.b32.xlu0 %v2096_v49, %s1880_s18 }
  0x48   : > { %985 = vrot.lane.b32.xlu1 %v2104_v51, %s1880_s18  ;;  %s355_s18 = scalar_lea.vmem [#allocation2], %s1490_s29 }
  0x4b   : > { %1756 = vrot.lane.b32.xlu0 %v1745_v16, %s1881_s20 }
  0x4c   : > { %1761 = vrot.lane.b32.xlu1 %v1750_v17, %s1881_s20  ;;  %s1424_s20 = sshll.u32 %s355_s18, 4  ;;  %s2378_s20 = int_to_ptr.vmem [resolvable:$true] %s1424_s20 }
  0x4d   : > { %s1809_s17 = scalar_lea.vmem %s2378_s20, 512 }
  0x4e   : > { %p1810_p11 = scmp.ne.s32.totalorder %s2378_s20, %s1809_s17 }
  0x4f   : > { %1021 = vrot.lane.b32.xlu0 %v2050_v25, %s1882_s21 }
  0x50   : > { %1025 = vrot.lane.b32.xlu1 %v2099_v50, %s1882_s21  ;;  %p1811_p12 = pnand %p1810_p11, %p1979_p5 }
  0x52   : > { %p1812_p13 = pneg %p1811_p12 }
  0x53   : > { %1019 = vrot.lane.b32.xlu0 %v2096_v49, %s1882_s21 }
  0x54   : > { %1023 = vrot.lane.b32.xlu1 %v2104_v51, %s1882_s21 }
  0x8e   : > { %v882_v43 = vpop.permute.xlu1 %881 }
  0x8f   : > { %v896_v53 = vsel %vm889_vm2, 0.0, %v882_v43 }
  0x92   : > { %v884_v48 = vpop.permute.xlu1 %883 }
  0x9a   : > { %v510_v18 = vpop.permute.xlu0 %509 }
  0x9e   : > { %v515_v19 = vpop.permute.xlu0 %514 }
  0xa2   : > { %v886_v44 = vpop.permute.xlu0 %885 }
  0xa3   : > { %v897_v54 = vsel %vm889_vm2, 0.0, %v886_v44 }
  0xa6   : > { %v1747_v52 = vpop.permute.xlu0 %1746 }
  0xa7   : > { %v1749_v0 = vunpack.i.h.bf16 %v1747_v52  ;;  %v1748_v1 = vunpack.i.l.bf16 %v1747_v52 }
  0xa9   : > { %v910_v11 = vsel %vm517_vm0, %v1748_v1, %v1749_v0 }
 0x104   : > { %v1563_v56 = vpop.f32.mrb[0].mxu0 }
 0x105   : > { %v1564_v57 = vpop.f32.mrb[1].mxu0 }
 0x106   : > { %v1565_v58 = vadd.f32 %v1564_v57, %v1563_v56  ;;  %v2210_v56 = vsel %vm865_vm3, 1.0, %v1874_v7  ;;  %v890_v57 = vsel %vm889_vm2, %v882_v43, %v884_v48 }
 0x108   : > { %v1566_v59 = vpop.f32.mrb[2].mxu0 }
 0x109   : > { %v1567_v60 = vpop.f32.mrb[3].mxu0 }
 0x10a   : > { %v1568_v61 = vadd.f32 %v1567_v60, %v1566_v59  ;;  %v900_v59 = vmul.f32 %v2210_v56, %v897_v54  ;;  %v888_v60 = vpop.permute.xlu1 %887 }
 0x10c   : > { %v1623_v62 = vpack.c.bf16 %v1568_v61, %v1565_v58  ;;  %v898_v58 = vmul.f32 %v2210_v56, %v896_v53  ;;  %v919_v61 = vpop.permute.xlu0 %918  ;;  %v1660_v53 = vpack.c.bf16 %v2099_v50, %v2050_v25 }
 0x10d   : > { %v933_v16 = vsel %vm926_vm5, 0.0, %v919_v61 }
 0x10e   : > { %1624 = vmatprep.subr.bf16.mxu0 %v1623_v62  ;;  %v1645_v4 = vpack.c.bf16 %v900_v59, %v898_v58  ;;  %v1752_v6 = vpop.permute.xlu1 %1751  ;;  %v1662_v59 = vpack.c.bf16 %v2104_v51, %v2096_v49 }
 0x10f   : > { %1626 = vmatpush3.bf16.msra.mxu0 %v1623_v62  ;;  %v2216_v62 = vsel %vm866_vm4, 1.0, %v1874_v7  ;;  %v1754_v9 = vunpack.i.h.bf16 %v1752_v6  ;;  %v1753_v10 = vunpack.i.l.bf16 %v1752_v6 }
 0x110   : > { %v899_v2 = vmul.f32 %v2216_v62, %v890_v57  ;;  %v923_v8 = vpop.permute.xlu0 %922 }
 0x111   : > { %v1649_v13 = vpack.c.bf16 %v1753_v10, %v1748_v1  ;;  %v911_v14 = vsel %vm517_vm0, %v1753_v10, %v1754_v9 }
 0x112   : > { %1582 = vmatmul.mubr.msk.f32.vlgmr.msra.gmra.mrb[4].mxu0 %vm517_vm0, %v417_v63  ;;  %v891_v63 = vsel %vm889_vm2, %v886_v44, %v888_v60  ;;  %v921_v17 = vpop.permute.xlu1 %920 }
 0x113   : > { %v901_v3 = vmul.f32 %v2216_v62, %v891_v63 }
 0x115   : > { %v1643_v5 = vpack.c.bf16 %v901_v3, %v899_v2 }
 0x1e5   : > { %v1583_v20 = vpop.f32.mrb[4].mxu0 }
 0x1e6   : > { %v590_v21 = vpop.f32.mrb[5].mxu0  ;;  %v596_v22 = vadd.f32 %v1583_v20, %v515_v19  ;;  %v1647_v19 = vpack.c.bf16 %v911_v14, %v910_v11  ;;  %v940_v20 = vpop.permute.xlu0 %939 }
 0x1e7   : > { %v591_v23 = vadd.f32 %v590_v21, %v510_v18  ;;  %v934_v18 = vsel %vm926_vm5, 0.0, %v923_v8  ;;  %v2237_v21 = vsel %vm872_vm8, 1.0, %v1874_v7  ;;  %v954_v32 = vsel %vm947_vm10, 0.0, %v940_v20 }
 0x1e8   : > { %v1497_v24 = vmul.f32 -1.442695, %v596_v22  ;;  %v927_v22 = vsel %vm926_vm5, %v919_v61, %v921_v17  ;;  %v956_v38 = vmul.f32 %v2210_v56, %v954_v32 }
 0x1e9   : > { %v1496_v26 = vmul.f32 -1.442695, %v591_v23  ;;  %v935_v23 = vmul.f32 %v2229_v15, %v933_v16 }
 0x1ea   : > { %1768 = vpow2.f32 %v1497_v24  ;;  %v937_v24 = vmul.f32 %v2229_v15, %v934_v18 }
 0x1eb   : > { %1770 = vpow2.f32 %v1496_v26  ;;  %v936_v26 = vmul.f32 %v2237_v21, %v927_v22 }
 0x1ec   : > { %v1654_v31 = vpack.c.bf16 %v937_v24, %v935_v23 }
 0x1f4   : > { %v1769_v27 = vpop.eup %1768 }
 0x1f5   : > { %v1771_v28 = vpop.eup %1770  ;;  %v606_v30 = vadd.f32 1.0, %v1769_v27  ;;  %v925_v27 = vpop.permute.xlu1 %924 }
 0x1f6   : > { %v605_v29 = vadd.f32 1.0, %v1771_v28  ;;  %v944_v28 = vpop.permute.xlu0 %943 }
 0x1f8   : > { %1772 = vrcp.f32 %v605_v29  ;;  %v928_v29 = vsel %vm926_vm5, %v923_v8, %v925_v27 }
 0x1f9   : > { %1774 = vrcp.f32 %v606_v30  ;;  %v938_v30 = vmul.f32 %v2237_v21, %v928_v29  ;;  %v942_v33 = vpop.permute.xlu1 %941 }
 0x1fa   : > { %v948_v37 = vsel %vm947_vm10, %v940_v20, %v942_v33 }
 0x1fb   : > { %v1652_v34 = vpack.c.bf16 %v938_v30, %v936_v26 }
 0x202   : > { %v1773_v39 = vpop.eup %1772 }
 0x203   : > { %1498 = vmatmul.mubr.msk.f32.vlgmr.msra.gmra.mrb[0].mxu1 %vm611_vm1, %v1773_v39  ;;  %v1775_v41 = vpop.eup %1774 }
 0x204   : > { %1638 = vmatpush1.bf16.msra.mxu1 %v1637_v35  ;;  %688 = vmatprep.mubr.f32.mxu1 %v1874_v7  ;;  %v955_v35 = vsel %vm947_vm10, 0.0, %v944_v28 }
 0x205   : > { %1640 = vmatprep.subr.bf16.mxu1 %v1639_v36  ;;  %v963_v36 = vpop.permute.xlu0 %962 }
 0x206   : > { %v975_v44 = vsel %vm968_vm11, %v963_v36, 0.0 }
 0x207   : > { %1499 = vmatmul.mubr.msk.f32.gmra.mrb[2].mxu1 %vm611_vm1, %v1775_v41  ;;  %v978_v47 = vmul.f32 %v2237_v21, %v975_v44 }
 0x208   : > { %1642 = vmatpush1.bf16.msra.mxu1 %v1641_v40  ;;  %759 = vmatprep.mubr.f32.mxu1 %v1874_v7  ;;  %v957_v40 = vmul.f32 %v2216_v62, %v948_v37 }
 0x209   : > { %1644 = vmatprep.subr.bf16.mxu1 %v1643_v5  ;;  %v961_v42 = vpop.permute.xlu0 %960 }
 0x20a   : > { %v969_v57 = vsel %vm968_vm11, %v961_v42, %v963_v36 }
 0x20b   : > { %1500 = vmatmul.mubr.msk.f32.vlgmr.msra.gmra.mrb[4].mxu1 %vm611_vm1, %v1773_v39  ;;  %v958_v39 = vmul.f32 %v2210_v56, %v955_v35  ;;  %v977_v60 = vmul.f32 %v2229_v15, %v969_v57 }
 0x20c   : > { %765 = vmatprep.mubr.f32.mxu1 %v1874_v7  ;;  %1646 = vmatpush1.bf16.msra.mxu1 %v1645_v4 }
 0x20d   : > { %1648 = vmatprep.subr.bf16.mxu1 %v1647_v19  ;;  %v1658_v46 = vpack.c.bf16 %v958_v39, %v956_v38  ;;  %v984_v54 = vpop.permute.xlu0 %983 }
 0x20e   : > { %v996_v2 = vsel %vm989_vm12, %v984_v54, 0.0 }
 0x20f   : > { %1501 = vmatmul.mubr.msk.f32.gmra.mrb[6].mxu1 %vm611_vm1, %v1775_v41  ;;  %v946_v41 = vpop.permute.xlu1 %945  ;;  %v999_v5 = vmul.f32 %v2216_v62, %v996_v2 }
 0x210   : > { %1651 = vmatpush1.bf16.msk.msra.mxu1 %vm1650_vm9, %v1649_v13  ;;  %v949_v43 = vsel %vm947_vm10, %v944_v28, %v946_v41 }
 0x211   : > { %1653 = vmatprep.subr.bf16.mxu1 %v1652_v34  ;;  %v959_v45 = vmul.f32 %v2216_v62, %v949_v43  ;;  %v982_v0 = vpop.permute.xlu0 %981 }
 0x212   : > { %v990_v10 = vsel %vm989_vm12, %v982_v0, %v984_v54  ;;  %v421_v0 = vld [vmem:[%s2427_s5 + $0x18] sm:$0xff] }
 0x213   : > { %v967_v48 = vpop.permute.xlu1 %966  ;;  %v1656_v52 = vpack.c.bf16 %v959_v45, %v957_v40  ;;  %v998_v12 = vmul.f32 %v2210_v56, %v990_v10 }
 0x214   : > { %1655 = vmatpush1.bf16.msra.mxu1 %v1654_v31  ;;  %v976_v55 = vsel %vm968_vm11, %v967_v48, 0.0 }
 0x215   : > { %v980_v58 = vmul.f32 %v2237_v21, %v976_v55  ;;  %1657 = vmatprep.subr.bf16.mxu1 %v1656_v52  ;;  %v1757_v8 = vpop.permute.xlu0 %1756 }
 0x216   : > { %v1759_v18 = vunpack.i.h.bf16 %v1757_v8  ;;  %v1758_v19 = vunpack.i.l.bf16 %v1757_v8 }
 0x217   : > { %v965_v61 = vpop.permute.xlu1 %964  ;;  %v1664_v63 = vpack.c.bf16 %v980_v58, %v978_v47 }
 0x218   : > { %1659 = vmatpush1.bf16.msra.mxu1 %v1658_v46  ;;  %v970_v1 = vsel %vm968_vm11, %v965_v61, %v967_v48  ;;  %v1011_v27 = vsel %vm1010_vm14, %v1758_v19, %v1759_v18  ;;  %v431_v19 = vld [vmem:[%s2431_s9 + $0x8] sm:$0xff] }
 0x219   : > { %1661 = vmatprep.subr.bf16.mxu1 %v1660_v53  ;;  %v979_v3 = vmul.f32 %v2229_v15, %v970_v1  ;;  %v1022_v16 = vpop.permute.xlu0 %1021  ;;  %v420_v1 = vld [vmem:[%s2427_s5 + $0x10] sm:$0xff] }
 0x21b   : > { %v1666_v4 = vpack.c.bf16 %v979_v3, %v977_v60  ;;  %v988_v6 = vpop.permute.xlu1 %987 }
 0x21c   : > { %1663 = vmatpush1.bf16.msra.mxu1 %v1662_v59  ;;  %v997_v9 = vsel %vm989_vm12, %v988_v6, 0.0 }
 0x21d   : > { %1665 = vmatprep.subr.bf16.mxu1 %v1664_v63  ;;  %v1001_v11 = vmul.f32 %v2216_v62, %v997_v9  ;;  %v1034_v62 = vsel %vm1027_vm13, %v1022_v16, 0.0  ;;  %v1020_v28 = vpop.permute.xlu0 %1019  ;;  %v418_v63 = vld [vmem:[%s2427_s5] sm:$0xff] }
 0x21e   : > { %v1037_v31 = vmul.f32 %v2237_v21, %v1034_v62  ;;  %v1028_v34 = vsel %vm1027_vm13, %v1020_v28, %v1022_v16 }
 0x21f   : > { %v986_v13 = vpop.permute.xlu1 %985  ;;  %v1668_v14 = vpack.c.bf16 %v1001_v11, %v999_v5  ;;  %v1036_v36 = vmul.f32 %v2229_v15, %v1028_v34 }
 0x220   : > { %1667 = vmatpush1.bf16.msra.mxu1 %v1666_v4  ;;  %v991_v17 = vsel %vm989_vm12, %v986_v13, %v988_v6 }
 0x221   : > { %v1000_v20 = vmul.f32 %v2210_v56, %v991_v17  ;;  %1669 = vmatprep.subr.bf16.mxu1 %v1668_v14 }
 0x223   : > { %v1670_v22 = vpack.c.bf16 %v1000_v20, %v998_v12  ;;  %v1762_v23 = vpop.permute.xlu1 %1761 }
 0x224   : > { %v1764_v24 = vunpack.i.h.bf16 %v1762_v23  ;;  %v1763_v26 = vunpack.i.l.bf16 %v1762_v23 }
 0x225   : > { %1671 = vmatpush1.bf16.msra.mxu1 %v1670_v22 }
 0x226   : > { %v1672_v29 = vpack.c.bf16 %v1764_v24, %v1759_v18  ;;  %v1012_v30 = vsel %vm1010_vm14, %v1763_v26, %v1764_v24  ;;  %v430_v18 = vld [vmem:[%s2431_s9] sm:$0xff] }
 0x227   : > { %v1026_v32 = vpop.permute.xlu1 %1025  ;;  %v1675_v33 = vpack.c.bf16 %v1012_v30, %v1011_v27  ;;  %v428_v27 = vld [vmem:[%s2430_s8] sm:$0xff]  ;;  %v429_v30 = vld [vmem:[%s2430_s8 + $0x8] sm:$0xff] }
 0x228   : > { %v1035_v56 = vsel %vm1027_vm13, %v1026_v32, 0.0  ;;  %1674 = vmatprep.subr.msk.bf16.mxu1 %vm1673_vm15, %v1672_v29 }
 0x229   : > { %v1039_v35 = vmul.f32 %v2237_v21, %v1035_v56  ;;  %1676 = vmatpush1.bf16.msra.mxu1 %v1675_v33  ;;  %v427_v33 = vld [vmem:[%s2428_s6 + $0x8] sm:$0xff] }
 0x22b   : > { %v1024_v37 = vpop.permute.xlu1 %1023  ;;  %v1677_v38 = vpack.c.bf16 %v1039_v35, %v1037_v31 }
 0x22c   : > { %v1029_v39 = vsel %vm1027_vm13, %v1024_v37, %v1026_v32  ;;  %v426_v37 = vld [vmem:[%s2428_s6] sm:$0xff] }
 0x22d   : > { %v1038_v40 = vmul.f32 %v2229_v15, %v1029_v39  ;;  %1678 = vmatprep.subr.bf16.mxu1 %v1677_v38 }
 0x22f   : > { %v1679_v41 = vpack.c.bf16 %v1038_v40, %v1036_v36 }
 0x231   : > { %1680 = vmatpush1.bf16.msra.mxu1 %v1679_v41 }
 0x2d6   : > { %v684_v42 = vpop.f32.mrb[0].mxu1 }
 0x2d7   : > { %v686_v43 = vpop.f32.mrb[1].mxu1  ;;  %v772_v46 = vmul.f32 %v684_v42, %v2096_v49 }
 0x2d8   : > { %v773_v21 = vmul.f32 %v686_v43, %v2050_v25  ;;  %v419_v25 = vld [vmem:[%s2427_s5 + $0x8] sm:$0xff] }
 0x2d9   : > { %1512 = vmatprep.mubr.msk.f32.mxu1 %vm517_vm0, %v419_v25  ;;  %v2344_v25 = vld [vmem:[%s2429_s7] sm:$0xff] }
 0x2da   : > { %v690_v44 = vpop.f32.mrb[2].mxu1  ;;  %1121 = vmatmul.mubr.f32.vlgmr.msra.gmra.mrb[8].mxu1 %v418_v63  ;;  %1588 = vmatprep.mubr.msk.f32.mxu0 %vm517_vm0, %v2344_v25 }
 0x2db   : > { %v692_v45 = vpop.f32.mrb[3].mxu1  ;;  %v774_v54 = vmul.f32 %v690_v44, %v2104_v51  ;;  %1513 = vmatprep.mubr.msk.f32.mxu1 %vm517_vm0, %v421_v0 }
 0x2dc   : > { %v775_v55 = vmul.f32 %v692_v45, %v2099_v50 }
 0x2de   : > { %v761_v47 = vpop.f32.mrb[4].mxu1  ;;  %1127 = vmatmul.mubr.f32.gmra.mrb[10].mxu1 %v420_v1 }
 0x2df   : > { %v776_v48 = vmul.f32 %v772_v46, %v761_v47  ;;  %v763_v52 = vpop.f32.mrb[5].mxu1 }
 0x2e0   : > { %v777_v53 = vmul.f32 %v773_v21, %v763_v52 }
 0x2e2   : > { %v767_v15 = vpop.f32.mrb[6].mxu1  ;;  %v780_v57 = vadd.f32 %v777_v53, %v776_v48 }
 0x2e3   : > { %v778_v58 = vmul.f32 %v774_v54, %v767_v15  ;;  %v769_v59 = vpop.f32.mrb[7].mxu1 }
 0x2e4   : > { %v779_v60 = vmul.f32 %v775_v55, %v769_v59  ;;  %781 = vadd.xlane.f32.xlu0 %v780_v57 }
 0x2e6   : > { %v783_v61 = vadd.f32 %v779_v60, %v778_v58 }
 0x2e8   : > { %784 = vadd.xlane.f32.xlu1 %v783_v61 }
 0x2f9   : > { %826 = vperm.xlu1 %1765, %v430_v18  }
 0x2fd   : > { %831 = vperm.xlu1 %1765, %v431_v19  }
 0x371   : > { %v782_v2 = vpop.xlane.xlu0 %781 }
 0x372   : > { %v786_v3 = vmul.f32 0.00390625, %v782_v2 }
 0x374   : > { %v788_v4 = vsub.f32 %v776_v48, %v786_v3  ;;  %v789_v5 = vsub.f32 %v777_v53, %v786_v3 }
 0x375   : > { %v785_v6 = vpop.xlane.xlu1 %784 }
 0x376   : > { %v787_v8 = vmul.f32 0.00390625, %v785_v6  ;;  %v792_v9 = vmul.f32 %v788_v4, %v788_v4  ;;  %v793_v10 = vmul.f32 %v789_v5, %v789_v5 }
 0x378   : > { %v790_v11 = vsub.f32 %v778_v58, %v787_v8  ;;  %v791_v12 = vsub.f32 %v779_v60, %v787_v8  ;;  %v796_v13 = vadd.f32 %v793_v10, %v792_v9 }
 0x379   : > { %v827_v38 = vpop.permute.xlu1 %826 }
 0x37a   : > { %797 = vadd.xlane.f32.xlu0 %v796_v13  ;;  %v794_v14 = vmul.f32 %v790_v11, %v790_v11  ;;  %v795_v16 = vmul.f32 %v791_v12, %v791_v12 }
 0x37c   : > { %v799_v17 = vadd.f32 %v795_v16, %v794_v14 }
 0x37d   : > { %v832_v39 = vpop.permute.xlu1 %831 }
 0x37e   : > { %800 = vadd.xlane.f32.xlu0 %v799_v17 }
 0x3ad   : > { %v1122_v31 = vpop.f32.mrb[8].mxu1 }
 0x3ae   : > { %v1124_v56 = vpop.f32.mrb[9].mxu1 }
 0x3b1   : > { %v1128_v35 = vpop.f32.mrb[10].mxu1 }
 0x3b2   : > { %v1130_v36 = vpop.f32.mrb[11].mxu1 }
 0x407   : > { %v798_v20 = vpop.xlane.xlu0 %797 }
 0x408   : > { %v802_v22 = vmul.f32 0.00390625, %v798_v20 }
 0x40a   : > { %v804_v23 = vadd.f32 1e-05, %v802_v22 }
 0x40b   : > { %v801_v24 = vpop.xlane.xlu0 %800 }
 0x40c   : > { %1776 = vrsqrt.f32 %v804_v23  ;;  %v803_v26 = vmul.f32 0.00390625, %v801_v24 }
 0x40e   : > { %v805_v62 = vadd.f32 1e-05, %v803_v26 }
 0x410   : > { %1778 = vrsqrt.f32 %v805_v62 }
 0x416   : > { %v1777_v28 = vpop.eup %1776 }
 0x417   : > { %v808_v29 = vmul.f32 %v1777_v28, %v428_v27 }
 0x419   : > { %812 = vperm.xlu1 %1765, %v808_v29  }
 0x41a   : > { %v1779_v32 = vpop.eup %1778 }
 0x41b   : > { %v809_v34 = vmul.f32 %v1779_v32, %v429_v30 }
 0x41d   : > { %1047 = vperm.xlu1 %1765, %v427_v33   ;;  %817 = vperm.xlu0 %1744, %v809_v34  }
 0x421   : > { %1042 = vperm.xlu0 %1744, %v426_v37  }
 0x498   : > { %v813_v40 = vpop.permute.xlu1 %812 }
 0x499   : > { %v820_v41 = vmul.f32 %v813_v40, %v788_v4  ;;  %v821_v42 = vmul.f32 %v813_v40, %v789_v5  ;;  %v423_v40 = vld [vmem:[%s2429_s7 + $0x8] sm:$0xff] }
 0x49b   : > { %v2317_v43 = vadd.f32 %v827_v38, %v820_v41  ;;  %v2319_v44 = vadd.f32 %v827_v38, %v821_v42 }
 0x49c   : > { %v818_v45 = vpop.permute.xlu0 %817  ;;  %v1048_v53 = vpop.permute.xlu1 %1047 }
 0x49d   : > { %v822_v46 = vmul.f32 %v818_v45, %v790_v11  ;;  %v823_v21 = vmul.f32 %v818_v45, %v791_v12  ;;  %v1133_v47 = vadd.f32 %v2319_v44, %v2317_v43  ;;  %v2333_v58 = vadd.f32 %v1128_v35, %v1048_v53 }
 0x49e   : > { %v2335_v59 = vadd.f32 %v1130_v36, %v1048_v53 }
 0x49f   : > { %v2323_v48 = vadd.f32 %v832_v39, %v822_v46  ;;  %v2325_v52 = vadd.f32 %v832_v39, %v823_v21  ;;  %1134 = vadd.xlane.f32.xlu0 %v1133_v47 }
 0x4a0   : > { %v1043_v54 = vpop.permute.xlu0 %1042  ;;  %v1144_v61 = vadd.f32 %v2335_v59, %v2333_v58 }
 0x4a1   : > { %v2327_v55 = vadd.f32 %v1122_v31, %v1043_v54  ;;  %v2329_v15 = vadd.f32 %v1124_v56, %v1043_v54  ;;  %v1136_v57 = vadd.f32 %v2325_v52, %v2323_v48  ;;  %v1883_v54 = vmov 1  }
 0x4a3   : > { %1137 = vadd.xlane.f32.xlu1 %v1136_v57  ;;  %v1141_v60 = vadd.f32 %v2329_v15, %v2327_v55 }
 0x4a5   : > { %1142 = vadd.xlane.f32.xlu0 %v1141_v60 }
 0x4a9   : > { %1145 = vadd.xlane.f32.xlu0 %v1144_v61 }
 0x52c   : > { %v1135_v63 = vpop.xlane.xlu0 %1134 }
 0x52d   : > { %v1139_v1 = vmul.f32 0.00390625, %v1135_v63 }
 0x530   : > { %v1138_v0 = vpop.xlane.xlu1 %1137 }
 0x531   : > { %v1140_v2 = vmul.f32 0.00390625, %v1138_v0 }
 0x532   : > { %v1143_v3 = vpop.xlane.xlu0 %1142 }
 0x533   : > { %v1149_v4 = vmax.f32 %v1139_v1, %v1140_v2  ;;  %v1147_v8 = vmul.f32 0.00390625, %v1143_v3 }
 0x535   : > { %v1150_v5 = vrot.slane %v1149_v4, 4 }
 0x536   : > { %v1146_v6 = vpop.xlane.xlu0 %1145 }
 0x537   : > { %v1148_v9 = vmul.f32 0.00390625, %v1146_v6  ;;  %v1151_v10 = vmax.f32 %v1149_v4, %v1150_v5 }
 0x539   : > { %v1164_v11 = vmax.f32 %v1147_v8, %v1148_v9  ;;  %v1152_v12 = vrot.slane %v1151_v10, 2 }
 0x53b   : > { %v1165_v13 = vrot.slane %v1164_v11, 4  ;;  %v1153_v14 = vmax.f32 %v1151_v10, %v1152_v12 }
 0x53d   : > { %v1166_v16 = vmax.f32 %v1164_v11, %v1165_v13  ;;  %v1154_v17 = vrot.slane %v1153_v14, 1 }
 0x53f   : > { %v1155_v18 = vmax.f32 %v1153_v14, %v1154_v17  ;;  %v1167_v19 = vrot.slane %v1166_v16, 2 }
 0x541   : > { %1689 = vpush %v1155_v18  ;;  %v1168_v20 = vmax.f32 %v1166_v16, %v1167_v19 }
 0x543   : > { %v1169_v22 = vrot.slane %v1168_v20, 1 }
 0x545   : > { %v1170_v23 = vmax.f32 %v1168_v20, %v1169_v22 }
 0x547   : > { %1691 = vpush %v1170_v23 }
 0x572   : > { %s1690_s11 = spop %1689 }
 0x573   : > { %v1157_v24 = vstv %s1690_s11  ;;  %s2375_s11 = scalar_lea.hbm %s2432_s10, %s1530_s12 }
 0x574   : > { %v1158_v26 = vsub.f32 %v1139_v1, %v1157_v24  ;;  %v1159_v62 = vsub.f32 %v1140_v2, %v1157_v24 }
 0x576   : > { %v1160_v27 = vmul.f32 1.442695, %v1158_v26  ;;  %v1162_v28 = vmul.f32 1.442695, %v1159_v62 }
 0x578   : > { %s1692_s26 = spop %1691  ;;  %1780 = vpow2.f32 %v1160_v27  ;;  %v1808_v27 = vld [vmem:[%s2035_s15 + $0x8] sm:$0xff]  ;;  %s2380_s15 = scalar_lea.sflag [#allocation3], %s353_s22 }
 0x579   : > { %v1172_v29 = vstv %s1692_s26  ;;  %1782 = vpow2.f32 %v1162_v28  ;;  %s1884_s26 = smov [#allocation2]  }
 0x57a   : > { %v1173_v30 = vsub.f32 %v1147_v8, %v1172_v29  ;;  %v1174_v31 = vsub.f32 %v1148_v9, %v1172_v29  ;;  %s1813_s27 = sshll.u32 %s1884_s26, 4  ;;  %s1814_s27 = int_to_ptr.vmem [resolvable:$false] %s1813_s27 }
 0x57b   : > { %s1815_s28 = scalar_lea.vmem %s1814_s27, 1024  ;;  %p1816_p0 = scmp.lt.s32.totalorder %s2378_s20, %s1814_s27 }
 0x57c   : > { %v1175_v32 = vmul.f32 1.442695, %v1173_v30  ;;  %v1177_v33 = vmul.f32 1.442695, %v1174_v31  ;;  %p1817_p1 = scmp.lt.s32.totalorder %s1815_s28, %s1809_s17 }
 0x57e   : > { %1784 = vpow2.f32 %v1175_v32  ;;  %p1818_p2 = por %p1817_p1, %p1816_p0 }
 0x57f   : > { %1786 = vpow2.f32 %v1177_v33 }
 0x580   : > { %p1819_p3 = pnand %p1818_p2, %p1812_p13 }
 0x582   : > { %v1781_v56 = vpop.eup %1780 }
 0x583   : > { %v1783_v34 = vpop.eup %1782 }
 0x588   : > { %v1785_v35 = vpop.eup %1784 }
 0x589   : > { %v1787_v36 = vpop.eup %1786  ;;  %v1179_v37 = vsel %vm947_vm10, %v1781_v56, %v1785_v35 }
 0x58a   : > { %v1180_v38 = vsel %vm947_vm10, %v1783_v34, %v1787_v36 }
 0x58b   : > { %v1681_v39 = vpack.c.bf16 %v1180_v38, %v1179_v37 }
 0x58d   : > { %1682 = vmatprep.subr.bf16.mxu0 %v1681_v39 }
 0x58e   : > { %1684 = vmatpush3.bf16.msra.mxu0 %v1681_v39 }
 0x591   : > { %1589 = vmatmul.mubr.msk.f32.vlgmr.msra.gmra.mrb[6].mxu0 %vm517_vm0, %v423_v40 }
 0x592   : > { %1364 = vmatprep.mubr.f32.mxu0 %v1874_v7 }
 0x664   : > { %v1590_v41 = vpop.f32.mrb[6].mxu0 }
 0x665   : > { %1788 = vrcp.f32 %v1590_v41  ;;  %v1253_v42 = vpop.f32.mrb[7].mxu0 }
 0x666   : > { %1790 = vrcp.f32 %v1253_v42 }
 0x66f   : > { %v1789_v45 = vpop.eup %1788 }
 0x670   : > { %v1791_v46 = vpop.eup %1790  ;;  %v1265_v21 = vmul.f32 %v1789_v45, %v1783_v34  ;;  %v1267_v57 = vmul.f32 %v1789_v45, %v1787_v36 }
 0x671   : > { %v1263_v47 = vmul.f32 %v1791_v46, %v1781_v56  ;;  %v1266_v53 = vmul.f32 %v1791_v46, %v1785_v35 }
 0x672   : > { %1275 = vperm.xlu0 %1744, %v1265_v21  }
 0x673   : > { %1270 = vperm.xlu1 %1765, %v1263_v47  }
 0x676   : > { %1767 = vset.pattern.permute.xlu0 %v1883_v54 }
 0x677   : > { %1766 = vset.pattern.permute.xlu1 %v1883_v54 }
 0x678   : > { %1284 = vperm.xlu1 %1766, %v1266_v53  }
 0x67c   : > { %1289 = vperm.xlu1 %1766, %v1267_v57  }
 0x6f1   : > { %v1276_v63 = vpop.permute.xlu0 %1275 }
 0x6f2   : > { %v1271_v60 = vpop.permute.xlu1 %1270  ;;  %v1280_v2 = vmul.f32 %v1276_v63, %v2333_v58  ;;  %v1281_v3 = vmul.f32 %v1276_v63, %v2335_v59 }
 0x6f3   : > { %v1278_v5 = vmul.f32 %v1271_v60, %v2327_v55  ;;  %v1279_v6 = vmul.f32 %v1271_v60, %v2329_v15 }
 0x6f7   : > { %v1285_v61 = vpop.permute.xlu1 %1284 }
 0x6f8   : > { %v1292_v0 = vmul.f32 %v1285_v61, %v2317_v43  ;;  %v1293_v1 = vmul.f32 %v1285_v61, %v2319_v44 }
 0x6fa   : > { %v1296_v10 = vadd.f32 %v1292_v0, %v1278_v5  ;;  %v1297_v11 = vadd.f32 %v1293_v1, %v1279_v6 }
 0x6fb   : > { %v1290_v4 = vpop.permute.xlu1 %1289 }
 0x6fc   : > { %v1294_v8 = vmul.f32 %v1290_v4, %v2323_v48  ;;  %v1295_v9 = vmul.f32 %v1290_v4, %v2325_v52 }
 0x6fe   : > { %v1298_v12 = vadd.f32 %v1294_v8, %v1280_v2  ;;  %v1299_v13 = vadd.f32 %v1295_v9, %v1281_v3 }
 0x700   : > { %v1687_v43 = vpack.c.bf16 %v1298_v12, %v1296_v10  ;;  %v1685_v14 = vpack.c.bf16 %v1299_v13, %v1297_v11 }
 0x702   : > { %1686 = vmatprep.subr.bf16.mxu0 %v1685_v14 }
 0x703   : > { %1688 = vmatpush1.bf16.msra.mxu0 %v1687_v43 }
 0x706   : > { %1516 = vmatmul.mubr.msk.f32.vlgmr.msra.gmra.mrb[8].mxu0 %vm517_vm0, %v2344_v25 }
 0x707   : > { %1370 = vmatprep.mubr.f32.mxu0 %v1874_v7 }
 0x70a   : > { %1517 = vmatmul.mubr.msk.f32.gmra.mrb[10].mxu0 %vm517_vm0, %v423_v40 }
 0x7d9   : > { %v1366_v44 = vpop.f32.mrb[8].mxu0 }
 0x7da   : > { %v1518_v55 = vmul.f32 -1.442695, %v1366_v44  ;;  %v1368_v48 = vpop.f32.mrb[9].mxu0 }
 0x7db   : > { %v1519_v15 = vmul.f32 -1.442695, %v1368_v48 }
 0x7dc   : > { %1792 = vpow2.f32 %v1518_v55 }
 0x7dd   : > { %1794 = vpow2.f32 %v1519_v15  ;;  %v1372_v52 = vpop.f32.mrb[10].mxu0 }
 0x7de   : > { %v1520_v58 = vmul.f32 -1.442695, %v1372_v52  ;;  %v1374_v59 = vpop.f32.mrb[11].mxu0 }
 0x7df   : > { %v1521_v16 = vmul.f32 -1.442695, %v1374_v59 }
 0x7e0   : > { %1796 = vpow2.f32 %v1520_v58 }
 0x7e1   : > { %1798 = vpow2.f32 %v1521_v16 }
 0x7e6   : > { %v1793_v17 = vpop.eup %1792 }
 0x7e7   : > { %v1795_v18 = vpop.eup %1794  ;;  %v1389_v25 = vadd.f32 1.0, %v1793_v17 }
 0x7e8   : > { %v1390_v7 = vadd.f32 1.0, %v1795_v18 }
 0x7e9   : > { %1800 = vrcp.f32 %v1389_v25 }
 0x7ea   : > { %v1797_v19 = vpop.eup %1796  ;;  %1802 = vrcp.f32 %v1390_v7 }
 0x7eb   : > { %v1799_v20 = vpop.eup %1798  ;;  %v1391_v22 = vadd.f32 1.0, %v1797_v19 }
 0x7ec   : > { %v1392_v23 = vadd.f32 1.0, %v1799_v20 }
 0x7ed   : > { %1804 = vrcp.f32 %v1391_v22 }
 0x7ee   : > { %1806 = vrcp.f32 %v1392_v23 }
 0x7f3   : > { %v1801_v24 = vpop.eup %1800 }
 0x7f4   : > { %v1803_v26 = vpop.eup %1802  ;;  %v1401_v62 = vmul.f32 %v1801_v24, %v2096_v49 }
 0x7f5   : > { %v1402_v28 = vmul.f32 %v1808_v27, %v1803_v26 }
 0x7f6   : > { %1405 = vst [vmem:[%s355_s18] sm:$0xff] %v1401_v62 }
 0x7f7   : > { %v1805_v29 = vpop.eup %1804  ;;  %1406 = vst [vmem:[%s355_s18 + $0x8] sm:$0xff] %v1402_v28 }
 0x7f8   : > { %v1807_v30 = vpop.eup %1806  ;;  %v1403_v31 = vmul.f32 %v1805_v29, %v2104_v51 }
 0x7f9   : > { %v1404_v32 = vmul.f32 %v1807_v30, %v2099_v50 }
 0x7fa   : > { %1407 = vst [vmem:[%s355_s18 + $0x10] sm:$0xff] %v1403_v31 }
 0x7fb   : > { %1408 = vst [vmem:[%s355_s18 + $0x18] sm:$0xff] %v1404_v32 }
 0x7fc   : > { %1822 = shalt.err (!%p1819_p3)
}
 0x7fd   : > { %s1823_s22 = scalar_lea.hbm %s2375_s11, 512  ;;  %s1827_s18 = scalar_lea.hbm %s2432_s10, 1024 }
 0x7fe   : > { %p1824_p4 = scmp.ne.s32.totalorder %s2375_s11, %s1823_s22  ;;  %p1828_p9 = scmp.lt.u32.totalorder %s2375_s11, %s2432_s10 }
 0x7ff   : > { %p1829_p10 = scmp.lt.u32.totalorder %s1827_s18, %s1823_s22  ;;  %p1831_p12 = scmp.lt.u32.totalorder %s1823_s22, %s2375_s11 }
 0x800   : > { %p1825_p7 = pnand %p1824_p4, %p1979_p5 }
 0x801   : > { %p1830_p11 = por %p1829_p10, %p1828_p9 }
 0x802   : > { %p1826_p8 = pneg %p1825_p7 }
 0x803   : > { %p1832_p13 = por %p1831_p12, %p1830_p11 }
 0x805   : > { %p1833_p0 = pnand %p1832_p13, %p1826_p8 }
 0x807   : > { %1836 = shalt.err (!%p1833_p0)
}
 0x808   : > { %s1885_s17 = smov 256  }
 0x809   : > { %1693 = dma.vmem_to_hbm [thread:$0]  (%p1979_p5), %s2378_s20, 512, %s2375_s11, %s2380_s15, %s1885_s17, %s1885_s17, %s1876_s30  }
 0x80a PF: > { %p1699_p1 = scmp.ge.s32.totalorder %s1871_s16, 2  ;;  %s1439_s26 = sand.u32 1, %s1859_s13  }
 0x80b   : > { %s1440_s27 = scalar_lea.sflag [#allocation3], %s1439_s26 }
 0x80c   : > { %p1696_p2 = pnand %p1699_p1, %p1983_p6 }
 0x80e   : > { %1854 = dma.done.wait (!%p1696_p2), %s1440_s27, 512  }
 0x80f   : > { %1856 = vsyncadd (!%p1696_p2), %s1440_s27, 4294966784  ;;  %s2440_s28 = sld [smem:[#allocation5_spill]]  ;;  %s2441_s15 = sld [smem:[#allocation6_spill]] }
 0x810   : > { %p20_p3 = scmp.ge.s32.totalorder %s1966_s19, 4   ;;  %s2442_s13 = smov %s1863_s14 }
 0x811   : > { %s2444_s16 = smov %s1966_s19 }
 0x812   :  { %22 = sbr.rel (!%p20_p3) target bundleno = 3 (0x3), region = 95 }
 0x815   : > { %s2443_s14 = smov %s2440_s28 }
 0x819   :  { %1445 = vsyncpa [#allocation3], 1 }
 0x81a   :  { %1447 = vsyncpa [#allocation3 + $0x1], 1 }

</bundles_post_ra>
